<compile_context>
chip_gen: v7x
topology: tpu7x:2x2x1
jax: 0.10.0
libtpu: 0.0.40
codegen_flags: <defaults>
</compile_context>

<pallas_src>
import functools
import math

import jax
import jax.numpy as jnp
import numpy as np
from jax.experimental import pallas as pl
from jax.experimental.pallas import tpu as pltpu

_VMEM_LIMIT = 32 * 1024 * 1024                 # scoped VMEM, safe on v5e/v6e/v7x
_NEG_PAD = -1e30                               # sigmoid(-1e30) == 0 exactly in f32
_LN_F32_TRUE_MIN = math.log(1.401298464324817e-45)   # ln(2**-149)


def _round_up(x, m):
    return -(-x // m) * m


# ----------------------------------------------------------------------------
# Kernel A (general C only): channel softmax -> fg (ch 1) and bg (ch 0)
# ----------------------------------------------------------------------------
def _softmax_fg_bg_kernel(x_ref, fg_ref, bg_ref):
    x = x_ref[...].astype(jnp.float32)                 # (B, C, TN)
    m = jnp.max(x, axis=1, keepdims=True)
    e = jnp.exp(x - m)
    inv = 1.0 / jnp.sum(e, axis=1, keepdims=True)      # (B, 1, TN)
    fg_ref[...] = e[:, 1, :] * inv[:, 0, :]
    bg_ref[...] = e[:, 0, :] * inv[:, 0, :]


# ----------------------------------------------------------------------------
# Kernel B: geometric-weighted streaming reduction over a sorted stream
# ----------------------------------------------------------------------------
def _geom_reduce_kernel(x_ref, out_ref, wbase_ref, *, steps, r_tile, ln_d,
                        apply_sigmoid):
    # x_ref:     (B, r_tile, 128) slab of the descending-sorted stream
    # out_ref:   (1, B, 128) per-shard partial sums; same block across the inner
    #            "arbitrary" axis -> VMEM-resident accumulator
    # wbase_ref: (r_tile, 128) scratch with d**(local rank), built once per shard
    s = pl.program_id(0)          # shard  ("parallel": both TensorCores on v7x)
    j = pl.program_id(1)          # step   ("arbitrary": reduction)

    @pl.when(j == 0)
    def _init():
        out_ref[...] = jnp.zeros_like(out_ref)
        r_iota = jax.lax.broadcasted_iota(jnp.int32, (r_tile, 128), 0)
        l_iota = jax.lax.broadcasted_iota(jnp.int32, (r_tile, 128), 1)
        k_local = (r_iota * 128 + l_iota).astype(jnp.float32)
        wbase_ref[...] = jnp.exp(k_local * ln_d)

    # d**(start + local) = d**start * wbase : one (1,128) exp per step instead
    # of a full-tile exp (keeps the EUP off the critical path at large tiles).
    start = ((s * steps + j) * (r_tile * 128)).astype(jnp.float32)
    scale = jnp.exp(jnp.full((1, 128), start * ln_d, dtype=jnp.float32))
    w = wbase_ref[...] * scale                               # (r_tile, 128)

    x = x_ref[...].astype(jnp.float32)                       # (B, r_tile, 128)
    if apply_sigmoid:
        # C == 2 path streams the sorted logit difference; fg = sigmoid(diff).
        # Padded lanes carry -1e30 -> sigmoid == 0, so no validity mask needed.
        x = 1.0 / (1.0 + jnp.exp(-x))
    out_ref[...] += jnp.sum(x * w[None, :, :], axis=1)[None]  # (1, B, 128)


def _geom_weighted_sum(stream, d, *, apply_sigmoid, pad_value, block_rows=None):
    """Per-batch sum_k stream[b, k] * d**k (stream already sorted descending)."""
    stream = stream.astype(jnp.float32)
    B, K = stream.shape
    rows = -(-K // 128)

    if block_rows is None:
        # ~4 MiB per in-flight input buffer (x2 for double-buffering), cap 1024
        # rows (128K lanes / block) -- fits the 32 MiB scoped VMEM everywhere.
        block_rows = (4 * 1024 * 1024) // (max(B, 1) * 128 * 4)
    r_tile = max(8, min(1024, (int(block_rows) // 8) * 8))
    r_tile = min(r_tile, _round_up(rows, 8))

    blocks = -(-rows // r_tile)
    num_shards = 2 if blocks >= 2 else 1          # expose both v7x TensorCores
    steps = -(-blocks // num_shards)
    rows_pad = num_shards * steps * r_tile
    k_pad = rows_pad * 128
    if k_pad != K:
        stream = jnp.pad(stream, ((0, 0), (0, k_pad - K)),
                         constant_values=pad_value)
    xr = stream.reshape(B, rows_pad, 128)         # sublane-dense layout

    kernel = functools.partial(_geom_reduce_kernel, steps=steps, r_tile=r_tile,
                               ln_d=math.log(d), apply_sigmoid=apply_sigmoid)
    partials = pl.pallas_call(
        kernel,
        out_shape=jax.ShapeDtypeStruct((num_shards, B, 128), jnp.float32),
        grid_spec=pltpu.PrefetchScalarGridSpec(
            num_scalar_prefetch=0,
            grid=(num_shards, steps),
            in_specs=[pl.BlockSpec((B, r_tile, 128),
                                   lambda s, j: (0, s * steps + j, 0))],
            out_specs=pl.BlockSpec((1, B, 128), lambda s, j: (s, 0, 0)),
            scratch_shapes=[pltpu.VMEM((r_tile, 128), jnp.float32)]),
        compiler_params=pltpu.CompilerParams(
            dimension_semantics=("parallel", "arbitrary"),
            vmem_limit_bytes=_VMEM_LIMIT),
    )(xr)
    return jnp.sum(partials, axis=(0, 2))         # (B,)


# ----------------------------------------------------------------------------
# Helpers
# ----------------------------------------------------------------------------
def _trunc_len(d, n):
    # Leading sorted terms with nonzero f32 weight d**k; beyond this the
    # geometric weights underflow to exactly 0 in f32, so truncation is exact.
    if d >= 1.0:
        return n
    k = int(math.ceil(_LN_F32_TRUE_MIN / math.log(d))) + 8   # safety margin
    return max(1, min(n, k))


def _softmax_tile(n, batch, channels, override=None):
    if override is not None:
        cap = max(128, (int(override) // 128) * 128)
    else:
        c8 = _round_up(max(channels, 1), 8)
        b8 = _round_up(max(batch, 1), 8)
        per_lane = 4 * (batch * c8 + 2 * b8)          # input tile + 2 outputs
        cap = (16 * 1024 * 1024) // (2 * per_lane)    # double-buffered budget
        cap = max(128, min(32768, (cap // 128) * 128))
    # Prefer the largest 128-multiple tile <= cap that divides n exactly (no
    # pad / slice HBM round trips); otherwise pad up to a tile multiple.
    t = min(cap, (n // 128) * 128)
    while t >= 128:
        if n % t == 0:
            return t, n
        t -= 128
    t = min(cap, _round_up(n, 128))
    return t, _round_up(n, t)


# ----------------------------------------------------------------------------
# Wrapper
# ----------------------------------------------------------------------------
def expand_loss(predicts, d_fg, d_bg, *, block_rows=None, softmax_tile=None):
    assert predicts.ndim == 4, "expected NCHW predictions"
    B, C, H, W = predicts.shape
    assert C >= 2, "ExpandLoss needs at least bg/fg channels"
    assert d_fg > 0.0 and d_bg > 0.0, "decay factors must be positive"
    N = H * W

    x = predicts.astype(jnp.float32).reshape(B, C, N)
    k_fg = _trunc_len(d_fg, N)
    k_bg = _trunc_len(d_bg, N)

    if C == 2:
        # softmax over 2 channels: fg = sigmoid(x1-x0), bg = sigmoid(x0-x1);
        # sigmoid is monotone, so sort / top_k the logit difference and apply
        # the sigmoid inside the reducer (no fg/bg materialized in HBM).
        diff = x[:, 1, :] - x[:, 0, :]
        if k_fg + k_bg >= N:
            # Truncation saves nothing: one full descending sort; the bg stream
            # is the negated / reversed fg stream.
            ds = -jnp.sort(-diff, axis=1)
            fg_stream = ds[:, :k_fg]
            bg_stream = (-ds[:, ::-1])[:, :k_bg]
        else:
            # TODO(synk): no Mosaic sort/top_k primitive; XLA top_k of the
            # nonzero-weight prefixes replaces the full descending sort.
            fg_stream = jax.lax.top_k(diff, k_fg)[0]
            bg_stream = jax.lax.top_k(-diff, k_bg)[0]
        s_fg = _geom_weighted_sum(fg_stream, d_fg, apply_sigmoid=True,
                                  pad_value=_NEG_PAD, block_rows=block_rows)
        s_bg = _geom_weighted_sum(bg_stream, d_bg, apply_sigmoid=True,
                                  pad_value=_NEG_PAD, block_rows=block_rows)
    else:
        # General C: Pallas channel-softmax kernel, then truncated sorted
        # streams of the fg / bg probabilities.
        tn1, n_pad1 = _softmax_tile(N, B, C, softmax_tile)
        x1 = x if n_pad1 == N else jnp.pad(x, ((0, 0), (0, 0), (0, n_pad1 - N)))
        fg, bg = pl.pallas_call(
            _softmax_fg_bg_kernel,
            out_shape=(jax.ShapeDtypeStruct((B, n_pad1), jnp.float32),
                       jax.ShapeDtypeStruct((B, n_pad1), jnp.float32)),
            grid_spec=pltpu.PrefetchScalarGridSpec(
                num_scalar_prefetch=0,
                grid=(n_pad1 // tn1,),
                in_specs=[pl.BlockSpec((B, C, tn1), lambda j: (0, 0, j))],
                out_specs=(pl.BlockSpec((B, tn1), lambda j: (0, j)),
                           pl.BlockSpec((B, tn1), lambda j: (0, j)))),
            compiler_params=pltpu.CompilerParams(
                dimension_semantics=("parallel",),
                vmem_limit_bytes=_VMEM_LIMIT),
        )(x1)
        if n_pad1 != N:
            fg, bg = fg[:, :N], bg[:, :N]
        fg_stream = jax.lax.top_k(fg, k_fg)[0]
        bg_stream = jax.lax.top_k(bg, k_bg)[0]
        s_fg = _geom_weighted_sum(fg_stream, d_fg, apply_sigmoid=False,
                                  pad_value=0.0, block_rows=block_rows)
        s_bg = _geom_weighted_sum(bg_stream, d_bg, apply_sigmoid=False,
                                  pad_value=0.0, block_rows=block_rows)

    # Closed-form geometric denominators (double precision) + tiny finalize.
    sum_wfg = float(N) if d_fg == 1.0 else (1.0 - d_fg ** N) / (1.0 - d_fg)
    sum_wbg = float(N) if d_bg == 1.0 else (1.0 - d_bg ** N) / (1.0 - d_bg)
    g_fg = s_fg * jnp.float32(1.0 / sum_wfg)
    g_bg = s_bg * jnp.float32(1.0 / sum_wbg)
    return -(jnp.mean(jnp.log(g_fg)) + jnp.mean(jnp.log(g_bg)))


# ----------------------------------------------------------------------------
# Pure-JAX reference mirroring the PyTorch forward
# ----------------------------------------------------------------------------
def expand_loss_ref(predicts, d_fg, d_bg):
    p = jax.nn.softmax(predicts.astype(jnp.float32), axis=1)
    B = p.shape[0]
    fg = p[:, 1].reshape(B, -1)
    bg = p[:, 0].reshape(B, -1)
    fg_s = -jnp.sort(-fg, axis=1)
    bg_s = -jnp.sort(-bg, axis=1)
    i = jnp.arange(fg.shape[1], dtype=jnp.float32)
    wfg = jnp.float32(d_fg) ** i
    wbg = jnp.float32(d_bg) ** i
    g_fg = jnp.sum(fg_s * wfg, axis=1) / jnp.sum(wfg)
    g_bg = jnp.sum(bg_s * wbg, axis=1) / jnp.sum(wbg)
    return -jnp.mean(jnp.log(g_fg)) - jnp.mean(jnp.log(g_bg))


if __name__ == "__main__":
    key = jax.random.PRNGKey(0)
    k1, k2, k3 = jax.random.split(key, 3)

    def check(xin, d_fg, d_bg, **kw):
        out = jax.block_until_ready(expand_loss(xin, d_fg, d_bg, **kw))
        ref = jax.block_until_ready(expand_loss_ref(xin, d_fg, d_bg))
        assert np.allclose(np.asarray(out), np.asarray(ref),
                           rtol=1e-4, atol=1e-5), (
            f"mismatch: kernel={float(out)} ref={float(ref)} "
            f"shape={tuple(xin.shape)} d=({d_fg},{d_bg})")

    # 1) Binary segmentation (C == 2), single-sort path; block_rows=8 forces a
    #    multi-block, 2-shard reduction (parallel axis + accumulation).
    x2 = jax.random.normal(k1, (2, 2, 64, 64), dtype=jnp.float32)
    check(x2, 0.996, 0.999, block_rows=8)

    # 2) C == 2 with fast decay: exercises the top_k truncation branch and the
    #    ragged stream padding inside the reducer.
    check(x2, 0.45, 0.55)

    # 3) Non-128-aligned spatial size (N = 400): stream padding path.
    x3 = jax.random.normal(k3, (2, 2, 20, 20), dtype=jnp.float32)
    check(x3, 0.996, 0.999)

    # 4) General-C fallback: Pallas channel softmax (multi-step grid) + the
    #    no-sigmoid reducer with 2 shards.
    x4 = jax.random.normal(k2, (2, 4, 64, 64), dtype=jnp.float32)
    check(x4, 0.996, 0.999, block_rows=8, softmax_tile=1024)

    print("KERNEL_OK")
</pallas_src>

<mosaic_0001>
module attributes {stable_mosaic.version = 11 : i64} {
  func.func @_geom_reduce_kernel(%arg0: i32, %arg1: i32, %arg2: memref<2x8x128xf32, #tpu.memory_space<vmem>>, %arg3: memref<1x2x128xf32, #tpu.memory_space<vmem>>, %arg4: memref<8x128xf32, #tpu.memory_space<vmem>>) attributes {dimension_semantics = [#tpu.dimension_semantics<parallel>, #tpu.dimension_semantics<arbitrary>], iteration_bounds = array<i64: 2, 2>, scalar_prefetch = 0 : i64, scratch_operands = 1 : i64, tpu.core_type = #tpu.core_type<tc>, window_params = [{transform_indices = @transform_0, window_bounds = array<i64: 2, 8, 128>}, {transform_indices = @transform_1, window_bounds = array<i64: 1, 2, 128>}]} {
    %c0_i32 = arith.constant 0 : i32
    %0 = arith.cmpi eq, %arg1, %c0_i32 : i32
    %1 = arith.extui %0 : i1 to i32
    %c0_i32_0 = arith.constant 0 : i32
    %2 = arith.cmpi ne, %1, %c0_i32_0 : i32
    scf.if %2 {
      %cst_15 = arith.constant 0.000000e+00 : f32
      %29 = vector.broadcast %cst_15 : f32 to vector<1x2x128xf32>
      %c0_16 = arith.constant 0 : index
      %c0_17 = arith.constant 0 : index
      %c0_18 = arith.constant 0 : index
      %30 = vector.load %arg3[%c0_16, %c0_17, %c0_18] : memref<1x2x128xf32, #tpu.memory_space<vmem>>, vector<1x2x128xf32>
      tpu.vector_store %arg3[%c0_16, %c0_17, %c0_18], %29 {strides = array<i32>} : memref<1x2x128xf32, #tpu.memory_space<vmem>>, vector<1x2x128xf32>,
      %31 = tpu.iota {dimensions = array<i32: 0>} : vector<8x128xi32>
      %32 = tpu.iota {dimensions = array<i32: 1>} : vector<8x128xi32>
      %c128_i32 = arith.constant 128 : i32
      %33 = vector.broadcast %c128_i32 : i32 to vector<8x128xi32>
      %34 = arith.muli %31, %33 : vector<8x128xi32>
      %35 = arith.addi %34, %32 : vector<8x128xi32>
      %36 = arith.sitofp %35 : vector<8x128xi32> to vector<8x128xf32>
      %cst_19 = arith.constant -0.00400802121 : f32
      %37 = vector.broadcast %cst_19 : f32 to vector<8x128xf32>
      %38 = arith.mulf %36, %37 : vector<8x128xf32>
      %39 = math.exp %38 : vector<8x128xf32>
      %c0_20 = arith.constant 0 : index
      %c0_21 = arith.constant 0 : index
      %40 = vector.load %arg4[%c0_20, %c0_21] : memref<8x128xf32, #tpu.memory_space<vmem>>, vector<8x128xf32>
      tpu.vector_store %arg4[%c0_20, %c0_21], %39 {strides = array<i32>} : memref<8x128xf32, #tpu.memory_space<vmem>>, vector<8x128xf32>,
    } else {
    }
    %c2_i32 = arith.constant 2 : i32
    %3 = arith.muli %arg0, %c2_i32 : i32
    %4 = arith.addi %3, %arg1 : i32
    %c1024_i32 = arith.constant 1024 : i32
    %5 = arith.muli %4, %c1024_i32 : i32
    %6 = arith.sitofp %5 : i32 to f32
    %cst = arith.constant -0.00400802121 : f32
    %7 = arith.mulf %6, %cst : f32
    %8 = vector.broadcast %7 : f32 to vector<1x128xf32>
    %9 = math.exp %8 : vector<1x128xf32>
    %c0 = arith.constant 0 : index
    %c0_1 = arith.constant 0 : index
    %10 = vector.load %arg4[%c0, %c0_1] : memref<8x128xf32, #tpu.memory_space<vmem>>, vector<8x128xf32>
    %11 = vector.broadcast %9 : vector<1x128xf32> to vector<8x128xf32>
    %12 = arith.mulf %10, %11 : vector<8x128xf32>
    %c0_2 = arith.constant 0 : index
    %c0_3 = arith.constant 0 : index
    %c0_4 = arith.constant 0 : index
    %13 = vector.load %arg2[%c0_2, %c0_3, %c0_4] : memref<2x8x128xf32, #tpu.memory_space<vmem>>, vector<2x8x128xf32>
    %cst_5 = arith.constant 0.000000e+00 : f32
    %14 = vector.broadcast %cst_5 : f32 to vector<2x8x128xf32>
    %15 = arith.subf %14, %13 : vector<2x8x128xf32>
    %16 = math.exp %15 : vector<2x8x128xf32>
    %cst_6 = arith.constant 1.000000e+00 : f32
    %17 = vector.broadcast %cst_6 : f32 to vector<2x8x128xf32>
    %18 = arith.addf %17, %16 : vector<2x8x128xf32>
    %cst_7 = arith.constant 1.000000e+00 : f32
    %19 = vector.broadcast %cst_7 : f32 to vector<2x8x128xf32>
    %20 = arith.divf %19, %18 : vector<2x8x128xf32>
    %c0_8 = arith.constant 0 : index
    %c0_9 = arith.constant 0 : index
    %c0_10 = arith.constant 0 : index
    %21 = vector.load %arg3[%c0_8, %c0_9, %c0_10] : memref<1x2x128xf32, #tpu.memory_space<vmem>>, vector<1x2x128xf32>
    %22 = vector.shape_cast %12 : vector<8x128xf32> to vector<1x8x128xf32>
    %23 = vector.broadcast %22 : vector<1x8x128xf32> to vector<2x8x128xf32>
    %24 = arith.mulf %20, %23 : vector<2x8x128xf32>
    %cst_11 = arith.constant dense<0.000000e+00> : vector<2x128xf32>
    %25 = vector.multi_reduction <add>, %24, %cst_11 [1] : vector<2x8x128xf32> to vector<2x128xf32>
    %26 = vector.shape_cast %25 : vector<2x128xf32> to vector<1x2x128xf32>
    %27 = arith.addf %21, %26 : vector<1x2x128xf32>
    %c0_12 = arith.constant 0 : index
    %c0_13 = arith.constant 0 : index
    %c0_14 = arith.constant 0 : index
    %28 = vector.load %arg3[%c0_12, %c0_13, %c0_14] : memref<1x2x128xf32, #tpu.memory_space<vmem>>, vector<1x2x128xf32>
    tpu.vector_store %arg3[%c0_12, %c0_13, %c0_14], %27 {strides = array<i32>} : memref<1x2x128xf32, #tpu.memory_space<vmem>>, vector<1x2x128xf32>,
    return
  }
  func.func @transform_0(%arg0: i32, %arg1: i32) -> (i32, i32, i32) {
    %c2_i32 = arith.constant 2 : i32
    %0 = arith.muli %arg0, %c2_i32 : i32
    %1 = arith.addi %0, %arg1 : i32
    %c0_i32 = arith.constant 0 : i32
    %c0_i32_0 = arith.constant 0 : i32
    %c0_i32_1 = arith.constant 0 : i32
    return %c0_i32, %1, %c0_i32_0 : i32, i32, i32
  }
  func.func @transform_1(%arg0: i32, %arg1: i32) -> (i32, i32, i32) {
    %c0_i32 = arith.constant 0 : i32
    %c0_i32_0 = arith.constant 0 : i32
    %c0_i32_1 = arith.constant 0 : i32
    return %arg0, %c0_i32, %c0_i32_0 : i32, i32, i32
  }
}

</mosaic_0001>

<bundles_post_ra>
// kernel: tpu_custom_call.1
= control target key start
LH: loop header
LB: loop body
LE: loop exit
PB: predicated region body
PF: predicated region fallthrough
CT: control target
= control target key end

     0   :  { %6 = vsyncpa [#allocation4], 0  ;;  %s858_s0 = inlined_call_operand.hbm [shape: f32[2,32,128], index: 0, kind: input, shape index: {}]   ;;  %s859_s1 = inlined_call_operand.hbm [shape: f32[2,2,128], index: 1, kind: output, shape index: {}]  }
   0x1   :  { %8 = vsyncpa [#allocation4 + $0x1], 0 }
   0x2   :  { %9 = vsyncpa [#allocation5], 0 }
   0x3   :  { %11 = vsyncpa [#allocation5 + $0x1], 0  ;;  %s620_s6 = smov 0   ;;  %s622_s7 = smov 0  }
   0x4   :  { %s624_s8 = smov 0   ;;  %s626_s9 = smov 0  }
   0x5   :  { %s628_s10 = smov 0   ;;  %s630_s11 = smov 0  }
   0x6   :  { %s632_s12 = smov 0   ;;  %s634_s13 = smov 0  }
   0x7   :  { %s636_s14 = smov 0   ;;  %s638_s15 = smov 0  }
   0x8   :  { %s640_s16 = smov 0  }
   0x9 LB: > { %s313_s17 = sadd.s32 4294967295, %s602_s16   ;;  %s314_s18 = sadd.s32 4294967294, %s602_s16   ;;  %s602_s16 = sphi %s640_s16, %s17_s16   ;;  %s598_s15 = sphi %s638_s15, %s878_s15   ;;  %s594_s14 = sphi %s636_s14, %s877_s14   ;;  %s590_s13 = sphi %s634_s13, %s876_s13   ;;  %s586_s12 = sphi %s632_s12, %s875_s12   ;;  %s582_s11 = sphi %s630_s11, %s874_s11   ;;  %s578_s10 = sphi %s628_s10, %s873_s10   ;;  %s574_s9 = sphi %s626_s9, %s872_s9   ;;  %s570_s8 = sphi %s624_s8, %s871_s8   ;;  %s566_s7 = sphi %s622_s7, %s870_s7   ;;  %s562_s6 = sphi %s620_s6, %s869_s6  }
   0xa   : > { %s26_s19 = sadd.s32 1, %s594_s14  ;;  %s29_s20 = sadd.s32 1, %s598_s15 }
   0xb   : > { %p27_p0 = scmp.ge.s32.totalorder %s26_s19, 2  ;;  %s315_s21 = sshll.u32 %s598_s15, 1 }
   0xc   : > { %s679_s22 = sadd.s32 %s594_s14, %s315_s21  ;;  %s40_s23 = sadd.s32 1, %s582_s11 }
   0xd   : > { %s880_s19 = smov (%p27_p0, %s26_s19), 0  ;;  %s882_s20 = smov (!%p27_p0, %s29_s20), %s598_s15 }
   0xe   : > { %p47_p1 = scmp.ne.s32.totalorder %s582_s11, %s578_s10  ;;  %p48_p2 = scmp.eq.s32.totalorder %s602_s16, 0 }
   0xf   : > { %p31_p3 = scmp.ge.s32.totalorder %s882_s20, 2  ;;  %p53_p4 = scmp.ne.s32.totalorder %s578_s10, %s574_s9 }
  0x10   : > { %p689_p5 = por %p48_p2, %p47_p1  ;;  %p54_p6 = scmp.eq.s32.totalorder %s313_s17, 0 }
  0x11   : > { %s884_s20 = smov (%p31_p3, %s882_s20), 0  ;;  %s66_s26 = sadd.s32 1, %s570_s8 }
  0x12   : > { %p695_p7 = por %p54_p6, %p53_p4  ;;  %s316_s27 = sshll.u32 %s884_s20, 1 }
  0x13   : > { %s63_s28 = ssub.s32 %s598_s15, %s884_s20  ;;  %s36_s29 = sadd.s32 %s316_s27, %s880_s19 }
  0x14   : > { %p64_p8 = scmp.eq.s32.totalorder %s63_s28, 0  ;;  %s37_s30 = ssub.s32 %s679_s22, %s36_s29 }
  0x15   : > { %p76_p9 = scmp.ne.s32.totalorder %s570_s8, %s566_s7  ;;  %p38_p10 = scmp.eq.s32.totalorder %s37_s30, 0 }
  0x16   : > { %p77_p11 = scmp.eq.s32.totalorder %s313_s17, 3  ;;  %p82_p13 = scmp.ne.s32.totalorder %s566_s7, %s562_s6 }
  0x17   : > { %s708_s2 = scalar_select %p64_p8, %s570_s8, %s66_s26  }
  0x18   : > { %s711_s3 = scalar_select %p38_p10, %s582_s11, %s40_s23  }
  0x19   : > { %p713_p12 = por %p77_p11, %p76_p9  ;;  %p83_p0 = scmp.eq.s32.totalorder %s314_s18, 3 }
  0x1a   : > { %p344_p1 = scmp.lt.s32.totalorder %s602_s16, 4  ;;  %s103_s5 = sand.u32 1, %s582_s11  }
  0x1b   : > { %s863_s4 = scalar_select %p713_p12, 1, 0 }
  0x1c   : > { %p723_p2 = por %p83_p0, %p82_p13  ;;  %s319_s21 = sshll.u32 %s103_s5, 4 }
  0x1d   : > { %s321_s17 = sshll.u32 %s679_s22, 7  ;;  %s107_s28 = scalar_lea.vmem [#allocation3], %s319_s21 }
  0x1e   : > { %s864_s9 = scalar_select %p723_p2, 1, 0 }
  0x1f   : > { %s731_s23 = scalar_lea.hbm %s858_s0, %s321_s17  ;;  %s115_s29 = sshll.u32 %s107_s28, 4  ;;  %s739_s29 = int_to_ptr.vmem [resolvable:$true] %s115_s29 }
  0x20   : > { %p735_p3 = pnand %p344_p1, %p689_p5  ;;  %s742_s22 = scalar_lea.sflag [#allocation4], %s103_s5 }
  0x21   : > { %s450_s30 = scalar_lea.hbm %s731_s23, 256  ;;  %s455_s17 = scalar_lea.hbm %s858_s0, 1024 }
  0x22   : > { %p451_p6 = scmp.ne.s32.totalorder %s731_s23, %s450_s30  ;;  %p452_p8 = pneg %p735_p3 }
  0x23   : > { %p456_p5 = scmp.lt.u32.totalorder %s731_s23, %s858_s0  ;;  %p457_p11 = scmp.lt.u32.totalorder %s455_s17, %s450_s30 }
  0x24   : > { %p453_p9 = pnand %p452_p8, %p451_p6  ;;  %p459_p0 = scmp.lt.u32.totalorder %s450_s30, %s731_s23 }
  0x25   : > { %p458_p13 = por %p457_p11, %p456_p5 }
  0x26   : > { %p454_p10 = pneg %p453_p9 }
  0x27   : > { %p460_p1 = por %p459_p0, %p458_p13 }
  0x29   : > { %p461_p4 = pnand %p460_p1, %p454_p10 }
  0x2b   : > { %464 = shalt.err (!%p461_p4)
}
  0x2c   : > { %s465_s5 = scalar_lea.vmem %s739_s29, 256  ;;  %s604_s28 = smov [#allocation3]  }
  0x2d   : > { %p466_p6 = scmp.ne.s32.totalorder %s739_s29, %s465_s5  ;;  %s470_s24 = sshll.u32 %s604_s28, 4  ;;  %s471_s24 = int_to_ptr.vmem [resolvable:$false] %s470_s24 }
  0x2e   : > { %s472_s21 = scalar_lea.vmem %s471_s24, 512  ;;  %p473_p12 = scmp.lt.s32.totalorder %s739_s29, %s471_s24 }
  0x2f   : > { %p468_p9 = pnand %p466_p6, %p452_p8  ;;  %p474_p5 = scmp.lt.s32.totalorder %s472_s21, %s465_s5 }
  0x31   : > { %p469_p2 = pneg %p468_p9  ;;  %p475_p11 = por %p474_p5, %p473_p12 }
  0x33   : > { %p476_p13 = pnand %p475_p11, %p469_p2 }
  0x35   : > { %479 = shalt.err (!%p476_p13)
}
  0x36   : > { %s605_s30 = smov 512   ;;  %s606_s17 = smov 128  }
  0x37   : > { %s607_s27 = smov 8   ;;  %p123_p4 = scmp.lt.s32.totalorder %s602_s16, 5 }
  0x38   : > { %339 = dma.hbm_to_vmem [thread:$0]  (!%p735_p3), %s731_s23, 256, %s739_s29, %s742_s22, %s605_s30, %s606_s17, %s607_s27  }
  0x39   : > { %p866_p8 = scmp.ge.s32.totalorder %s602_s16, 1 }
  0x3b   : > { %p124_p10 = pnand %p866_p8, %p123_p4 }
  0x3c   : > { %s129_s26 = sand.u32 (!%p124_p10), 1, %s578_s10  }
  0x3d   : > { %127 = sbr.rel (%p124_p10) target bundleno = 157 (0x9d), region = 24  ;;  %s323_s5 = sshll.u32 (!%p124_p10), %s129_s26, 4 }
  0x3e   : > { %s130_s28 = scalar_lea.sflag (!%p124_p10), [#allocation4], %s129_s26  ;;  %s133_s24 = scalar_lea.vmem (!%p124_p10), [#allocation3], %s323_s5 }
  0x44   : > { %553 = dma.done.wait (%p695_p7), %s130_s28, 256  }
  0x45   : > { %555 = vsyncadd (%p695_p7), %s130_s28, 4294967040  ;;  %s149_s21 = sand.u32 1, %s566_s7   ;;  %p325_p12 = scmp.ne.s32.totalorder %s586_s12, 0 }
  0x46   : > { %s324_s23 = sshll.u32 %s149_s21, 1  ;;  %v159_v0 = vlaneseq (!%p325_p12)  ;;  %v608_v1 = vmov (!%p325_p12), 0.0  }
  0x47   : > { %s781_s29 = scalar_lea.vmem [#allocation6], %s324_s23  ;;  %157 = sbr.rel (%p325_p12) target bundleno = 96 (0x60), region = 32 }
  0x48   : > { %158 = vst [vmem:[%s781_s29] sm:$0x3] (!%p325_p12), %v608_v1  ;;  %v160_v2 = vshrl.u32 (!%p325_p12), %v159_v0, 7  ;;  %v162_v3 = vand.u32 (!%p325_p12), 127, %v159_v0 }
  0x4a   : > { %v163_v4 = vmul.u32 (!%p325_p12), 128, %v160_v2 }
  0x4c   : > { %v164_v5 = vadd.s32 (!%p325_p12), %v163_v4, %v162_v3 }
  0x4e   : > { %v165_v6 = vcvt.s32.f32 %v164_v5 }
  0x50   : > { %v166_v7 = vmul.f32 -0.004008021, %v165_v6 }
  0x52   : > { %v167_v8 = vmul.f32 1.442695, %v166_v7 }
  0x54   : > { %438 = vpow2.f32 %v167_v8 }
  0x5e   : > { %v439_v9 = vpop.eup %438 }
  0x5f   : > { %169 = vst [vmem:[#allocation2] sm:$0xff] %v439_v9 }
  0x60 PF: > { %s326_s25 = sshll.u32 %s590_s13, 1  ;;  %v180_v10 = vld [vmem:[%s133_s24] sm:$0xff]  ;;  %v181_v11 = vld [vmem:[%s133_s24 + $0x8] sm:$0xff]  ;;  %vm211_vm0 = vcmask 1041409   ;;  %s230_s27 = sshll.u32 %s781_s29, 4  ;;  %s795_s27 = int_to_ptr.vmem [resolvable:$true] %s230_s27 }
  0x61   : > { %s171_s18 = sadd.s32 %s586_s12, %s326_s25  ;;  %v182_v12 = vsub.f32 0.0, %v180_v10  ;;  %v183_v13 = vsub.f32 0.0, %v181_v11  ;;  %v194_v40 = vld [vmem:[%s781_s29] sm:$0x3]  ;;  %s329_s12 = sshll.u32 %s590_s13, 5 }
  0x62   : > { %s327_s22 = sshll.u32 %s171_s18, 10  ;;  %s793_s28 = scalar_lea.hbm %s859_s1, %s329_s12 }
  0x63   : > { %s173_s30 = scvt.s32.f32 %s327_s22  ;;  %v184_v14 = vmul.f32 1.442695, %v182_v12  ;;  %v186_v15 = vmul.f32 1.442695, %v183_v13  ;;  %s217_s24 = scalar_lea.sflag [#allocation5], %s149_s21 }
  0x64   : > { %s480_s23 = scalar_lea.vmem %s795_s27, 32  ;;  %p867_p2 = scmp.ne.s32.totalorder %s863_s4, 0 }
  0x65   : > { %s174_s17 = smul.f32 -0.004008021, %s173_s30  ;;  %440 = vpow2.f32 %v184_v14  ;;  %p481_p7 = scmp.ne.s32.totalorder %s795_s27, %s480_s23 }
  0x66   : > { %442 = vpow2.f32 %v186_v15  ;;  %v178_v23 = vld [vmem:[#allocation2] sm:$0xff]  ;;  %s609_s13 = smov [#allocation6]  }
  0x67   : > { %v175_v16 = vstv %s174_s17  ;;  %p482_p3 = pnand %p481_p7, %p867_p2  ;;  %s484_s25 = sshll.u32 %s609_s13, 4  ;;  %s485_s25 = int_to_ptr.vmem [resolvable:$false] %s484_s25 }
  0x68   : > { %v176_v17 = vmul.f32 1.442695, %v175_v16  ;;  %s486_s18 = scalar_lea.vmem %s485_s25, 64  ;;  %p487_p1 = scmp.lt.s32.totalorder %s795_s27, %s485_s25 }
  0x69   : > { %p483_p0 = pneg %p482_p3  ;;  %p488_p6 = scmp.lt.s32.totalorder %s486_s18, %s480_s23 }
  0x6a   : > { %444 = vpow2.f32 %v176_v17 }
  0x6b   : > { %p489_p9 = por %p488_p6, %p487_p1 }
  0x6d   : > { %p490_p5 = pnand %p489_p9, %p483_p0 }
  0x6f   : > { %v441_v18 = vpop.eup %440 }
  0x70   : > { %v443_v19 = vpop.eup %442  ;;  %v188_v20 = vadd.f32 1.0, %v441_v18 }
  0x71   : > { %v189_v21 = vadd.f32 1.0, %v443_v19 }
  0x72   : > { %446 = vrcp.f32 %v188_v20 }
  0x73   : > { %448 = vrcp.f32 %v189_v21 }
  0x74   : > { %v445_v22 = vpop.eup %444 }
  0x75   : > { %v179_v24 = vmul.f32 %v445_v22, %v178_v23 }
  0x7c   : > { %v447_v25 = vpop.eup %446 }
  0x7d   : > { %v449_v26 = vpop.eup %448  ;;  %v195_v27 = vmul.f32 %v447_v25, %v179_v24 }
  0x7e   : > { %v196_v28 = vmul.f32 %v449_v26, %v179_v24 }
  0x7f   : > { %v197_v29 = vrot.slane %v195_v27, 4 }
  0x80   : > { %v203_v30 = vrot.slane %v196_v28, 4 }
  0x81   : > { %v198_v31 = vadd.f32 %v197_v29, %v195_v27 }
  0x82   : > { %v204_v32 = vadd.f32 %v203_v30, %v196_v28 }
  0x83   : > { %v199_v33 = vrot.slane %v198_v31, 2 }
  0x84   : > { %v205_v34 = vrot.slane %v204_v32, 2 }
  0x85   : > { %v200_v35 = vadd.f32 %v199_v33, %v198_v31 }
  0x86   : > { %v206_v36 = vadd.f32 %v205_v34, %v204_v32 }
  0x87   : > { %v201_v37 = vrot.slane %v200_v35, 1 }
  0x88   : > { %v207_v38 = vrot.slane %v206_v36, 1 }
  0x89   : > { %v202_v39 = vadd.f32 %v201_v37, %v200_v35 }
  0x8a   : > { %v208_v41 = vadd.f32 %v207_v38, %v206_v36 }
  0x8c   : > { %v212_v42 = vsel %vm211_vm0, %v208_v41, %v202_v39 }
  0x8d   : > { %v214_v43 = vadd.f32 %v212_v42, %v194_v40 }
  0x8f   : > { %215 = vst [vmem:[%s781_s29] sm:$0x3] %v214_v43 }
  0x90   : > { %493 = shalt.err (!%p490_p5)
}
  0x91   : > { %s494_s21 = scalar_lea.hbm %s793_s28, 32  ;;  %s498_s30 = scalar_lea.hbm %s859_s1, 64 }
  0x92   : > { %p495_p11 = scmp.ne.s32.totalorder %s793_s28, %s494_s21  ;;  %p499_p8 = scmp.lt.u32.totalorder %s793_s28, %s859_s1 }
  0x93   : > { %p500_p10 = scmp.lt.u32.totalorder %s498_s30, %s494_s21  ;;  %p502_p7 = scmp.lt.u32.totalorder %s494_s21, %s793_s28 }
  0x94   : > { %p496_p13 = pnand %p495_p11, %p867_p2 }
  0x95   : > { %p501_p12 = por %p500_p10, %p499_p8 }
  0x96   : > { %p497_p4 = pneg %p496_p13 }
  0x97   : > { %p503_p3 = por %p502_p7, %p501_p12 }
  0x99   : > { %p504_p0 = pnand %p503_p3, %p497_p4 }
  0x9b   : > { %507 = shalt.err (!%p504_p0)
}
  0x9c   : > { %334 = dma.vmem_to_hbm [thread:$0]  (%p867_p2), %s795_s27, 32, %s793_s28, %s217_s24  }
  0x9d PF: > { %p345_p1 = scmp.ge.s32.totalorder %s602_s16, 2  ;;  %s242_s26 = sand.u32 1, %s562_s6  }
  0x9e   : > { %p868_p6 = scmp.ne.s32.totalorder %s864_s9, 0  ;;  %s243_s5 = scalar_lea.sflag [#allocation5], %s242_s26 }
  0xa0   : > { %p341_p9 = pnand %p345_p1, %p868_p6 }
  0xa2   : > { %557 = dma.done.wait (!%p341_p9), %s243_s5, 32  }
  0xa3   : > { %559 = vsyncadd (!%p341_p9), %s243_s5, 4294967264  ;;  %s17_s16 = sadd.s32 1, %s602_s16   ;;  %s869_s6 = smov %s566_s7 }
  0xa4   : > { %p14_p5 = scmp.ge.s32.totalorder %s17_s16, 6   ;;  %s870_s7 = smov %s570_s8 }
  0xa5   : > { %s871_s8 = smov %s708_s2  ;;  %s872_s9 = smov %s578_s10 }
  0xa6   : > { %s873_s10 = smov %s582_s11  ;;  %s874_s11 = smov %s711_s3 }
  0xa7   : > { %s875_s12 = smov %s594_s14  ;;  %s876_s13 = smov %s598_s15 }
  0xa8   : > { %s877_s14 = smov %s880_s19  ;;  %s878_s15 = smov %s884_s20 }
  0xa9   :  { %16 = sbr.rel (!%p14_p5) target bundleno = 9 (0x9), region = 73 }
  0xb0   :  { %248 = vsyncpa [#allocation4], 1 }
  0xb1   :  { %250 = vsyncpa [#allocation4 + $0x1], 1 }
  0xb2   :  { %251 = vsyncpa [#allocation5], 1 }
  0xb3   :  { %253 = vsyncpa [#allocation5 + $0x1], 1 }

</bundles_post_ra>
